<compile_context>
chip_gen: v7x
topology: tpu7x:2x2x1
jax: 0.10.0
libtpu: 0.0.40
codegen_flags: <defaults>
</compile_context>

<pallas_src>
import functools

import jax
import jax.numpy as jnp
from jax.experimental import pallas as pl
from jax.experimental.pallas import tpu as pltpu


def _actor_kernel(max_action,
                  x_ref, w1_ref, b1_ref, w2_ref, b2_ref, w3_ref, b3_ref,
                  o_ref):
    # Layer 1: Linear(state_dim -> H1) + ReLU  (Dropout == identity in eval)
    x = x_ref[...].astype(jnp.bfloat16)
    h1 = jnp.dot(x, w1_ref[...], preferred_element_type=jnp.float32)
    h1 = jnp.maximum(h1 + b1_ref[...], 0.0)

    # Layer 2: Linear(H1 -> H2) + ReLU
    h2 = jnp.dot(h1.astype(jnp.bfloat16), w2_ref[...],
                 preferred_element_type=jnp.float32)
    h2 = jnp.maximum(h2 + b2_ref[...], 0.0)

    # Layer 3: Linear(H2 -> A) + Tanh, scaled by max_action
    h3 = jnp.dot(h2.astype(jnp.bfloat16), w3_ref[...],
                 preferred_element_type=jnp.float32)
    out = jnp.tanh(h3 + b3_ref[...]) * max_action

    o_ref[...] = out.astype(o_ref.dtype)


def _round_up(x, m):
    return ((x + m - 1) // m) * m


def _pad2d(x, rows, cols):
    r, c = x.shape
    if r == rows and c == cols:
        return x
    return jnp.pad(x, ((0, rows - r), (0, cols - c)))


def actor_forward(state, params, max_action):
    """state: [B, state_dim] float32.  params: dict of f32 weights/biases
    with weights stored as [in_features, out_features]."""
    w1, b1, w2, b2, w3, b3 = (params["w1"], params["b1"], params["w2"],
                              params["b2"], params["w3"], params["b3"])
    B, S = state.shape
    H1, H2, A = w1.shape[1], w2.shape[1], w3.shape[1]
    H1p, H2p, Ap = (_round_up(d, 128) for d in (H1, H2, A))

    # Pad to lane-dense shapes; cast weights to bf16 (biases stay f32 and are
    # added to the f32 accumulator). Zero-padded rows/cols contribute exactly 0.
    w1p = _pad2d(w1, S, H1p).astype(jnp.bfloat16)
    b1p = _pad2d(b1, 1, H1p)
    w2p = _pad2d(w2, H1p, H2p).astype(jnp.bfloat16)
    b2p = _pad2d(b2, 1, H2p)
    w3p = _pad2d(w3, H2p, Ap).astype(jnp.bfloat16)
    b3p = _pad2d(b3, 1, Ap)

    # Batch tiling: large tiles amortize per-step overhead; small batches just
    # round up to a sublane multiple (8) and run a single grid step.
    TB = 512 if B >= 512 else _round_up(B, 8)
    Bp = _round_up(B, TB)
    xp = _pad2d(state, Bp, S)
    grid = (Bp // TB,)

    kernel = functools.partial(_actor_kernel, float(max_action))

    # Weights/biases: same block for every grid step -> stay VMEM-resident.
    resident = lambda shape: pl.BlockSpec(shape, lambda i: (0, 0))

    out = pl.pallas_call(
        kernel,
        out_shape=jax.ShapeDtypeStruct((Bp, Ap), jnp.float32),
        grid=grid,
        in_specs=[
            pl.BlockSpec((TB, S), lambda i: (i, 0)),   # state: tiled over batch
            resident((S, H1p)), resident((1, H1p)),
            resident((H1p, H2p)), resident((1, H2p)),
            resident((H2p, Ap)), resident((1, Ap)),
        ],
        out_specs=pl.BlockSpec((TB, Ap), lambda i: (i, 0)),
        compiler_params=pltpu.CompilerParams(
            dimension_semantics=("parallel",)),
    )(xp, w1p, b1p, w2p, b2p, w3p, b3p)

    return out[:B, :A]


def init_params(key, state_dim, action_dim):
    """Deterministic init mimicking nn.Linear's U(-1/sqrt(in), 1/sqrt(in))."""
    dims = [(state_dim, 400), (400, 300), (300, action_dim)]
    params = {}
    for i, (fan_in, fan_out) in enumerate(dims, start=1):
        key, kw, kb = jax.random.split(key, 3)
        bound = 1.0 / jnp.sqrt(jnp.float32(fan_in))
        params[f"w{i}"] = jax.random.uniform(
            kw, (fan_in, fan_out), jnp.float32, minval=-bound, maxval=bound)
        params[f"b{i}"] = jax.random.uniform(
            kb, (1, fan_out), jnp.float32, minval=-bound, maxval=bound)
    return params


def actor_reference(state, params, max_action):
    """Pure-JAX f32 reference for correctness check."""
    h = jnp.maximum(state @ params["w1"] + params["b1"], 0.0)
    h = jnp.maximum(h @ params["w2"] + params["b2"], 0.0)
    return max_action * jnp.tanh(h @ params["w3"] + params["b3"])


if __name__ == "__main__":
    key = jax.random.PRNGKey(0)
    state_dim, action_dim, max_action = 32, 8, 2.0
    batch = 8

    key, kp, kx = jax.random.split(key, 3)
    params = init_params(kp, state_dim, action_dim)
    state = jax.random.normal(kx, (batch, state_dim), jnp.float32)

    out = actor_forward(state, params, max_action)
    out = jax.block_until_ready(out)

    ref = actor_reference(state, params, max_action)
    assert out.shape == (batch, action_dim)
    # bf16 weights -> relax tolerance vs. the f32 reference.
    assert jnp.allclose(out, ref, atol=2e-2, rtol=2e-2), (
        f"max abs err {jnp.max(jnp.abs(out - ref))}")

    print("KERNEL_OK")
</pallas_src>

<mosaic_0001>
module attributes {stable_mosaic.version = 11 : i64} {
  func.func @_actor_kernel(%arg0: i32, %arg1: memref<8x32xf32, #tpu.memory_space<vmem>>, %arg2: memref<32x512xbf16, #tpu.memory_space<vmem>>, %arg3: memref<1x512xf32, #tpu.memory_space<vmem>>, %arg4: memref<512x384xbf16, #tpu.memory_space<vmem>>, %arg5: memref<1x384xf32, #tpu.memory_space<vmem>>, %arg6: memref<384x128xbf16, #tpu.memory_space<vmem>>, %arg7: memref<1x128xf32, #tpu.memory_space<vmem>>, %arg8: memref<8x128xf32, #tpu.memory_space<vmem>>) attributes {dimension_semantics = [#tpu.dimension_semantics<parallel>], iteration_bounds = array<i64: 1>, scalar_prefetch = 0 : i64, scratch_operands = 0 : i64, tpu.core_type = #tpu.core_type<tc>, window_params = [{transform_indices = @transform_0, window_bounds = array<i64: 8, 32>}, {pipeline_mode = #tpu.pipeline_mode<synchronous>, transform_indices = @transform_1, window_bounds = array<i64: 32, 512>}, {pipeline_mode = #tpu.pipeline_mode<synchronous>, transform_indices = @transform_2, window_bounds = array<i64: 1, 512>}, {pipeline_mode = #tpu.pipeline_mode<synchronous>, transform_indices = @transform_3, window_bounds = array<i64: 512, 384>}, {pipeline_mode = #tpu.pipeline_mode<synchronous>, transform_indices = @transform_4, window_bounds = array<i64: 1, 384>}, {pipeline_mode = #tpu.pipeline_mode<synchronous>, transform_indices = @transform_5, window_bounds = array<i64: 384, 128>}, {pipeline_mode = #tpu.pipeline_mode<synchronous>, transform_indices = @transform_6, window_bounds = array<i64: 1, 128>}, {transform_indices = @transform_7, window_bounds = array<i64: 8, 128>}]} {
    %c0 = arith.constant 0 : index
    %c0_0 = arith.constant 0 : index
    %0 = vector.load %arg1[%c0, %c0_0] : memref<8x32xf32, #tpu.memory_space<vmem>>, vector<8x32xf32>
    %1 = arith.truncf %0 : vector<8x32xf32> to vector<8x32xbf16>
    %c0_1 = arith.constant 0 : index
    %c0_2 = arith.constant 0 : index
    %2 = vector.load %arg2[%c0_1, %c0_2] : memref<32x512xbf16, #tpu.memory_space<vmem>>, vector<32x512xbf16>
    %cst = arith.constant dense<0.000000e+00> : vector<8x512xf32>
    %3 = tpu.matmul %1, %2, %cst {dimension_numbers = #tpu.dot_dimension_numbers<[1], [0], [0], [1], [0, 0, 1, 1], [], []>} : vector<8x32xbf16>, vector<32x512xbf16>, vector<8x512xf32> -> vector<8x512xf32>
    %c0_3 = arith.constant 0 : index
    %c0_4 = arith.constant 0 : index
    %4 = vector.load %arg3[%c0_3, %c0_4] : memref<1x512xf32, #tpu.memory_space<vmem>>, vector<1x512xf32>
    %5 = vector.broadcast %4 : vector<1x512xf32> to vector<8x512xf32>
    %6 = arith.addf %3, %5 : vector<8x512xf32>
    %cst_5 = arith.constant 0.000000e+00 : f32
    %7 = vector.broadcast %cst_5 : f32 to vector<8x512xf32>
    %8 = arith.maximumf %6, %7 : vector<8x512xf32>
    %9 = arith.truncf %8 : vector<8x512xf32> to vector<8x512xbf16>
    %c0_6 = arith.constant 0 : index
    %c0_7 = arith.constant 0 : index
    %10 = vector.load %arg4[%c0_6, %c0_7] : memref<512x384xbf16, #tpu.memory_space<vmem>>, vector<512x384xbf16>
    %cst_8 = arith.constant dense<0.000000e+00> : vector<8x384xf32>
    %11 = tpu.matmul %9, %10, %cst_8 {dimension_numbers = #tpu.dot_dimension_numbers<[1], [0], [0], [1], [0, 0, 1, 1], [], []>} : vector<8x512xbf16>, vector<512x384xbf16>, vector<8x384xf32> -> vector<8x384xf32>
    %c0_9 = arith.constant 0 : index
    %c0_10 = arith.constant 0 : index
    %12 = vector.load %arg5[%c0_9, %c0_10] : memref<1x384xf32, #tpu.memory_space<vmem>>, vector<1x384xf32>
    %13 = vector.broadcast %12 : vector<1x384xf32> to vector<8x384xf32>
    %14 = arith.addf %11, %13 : vector<8x384xf32>
    %cst_11 = arith.constant 0.000000e+00 : f32
    %15 = vector.broadcast %cst_11 : f32 to vector<8x384xf32>
    %16 = arith.maximumf %14, %15 : vector<8x384xf32>
    %17 = arith.truncf %16 : vector<8x384xf32> to vector<8x384xbf16>
    %c0_12 = arith.constant 0 : index
    %c0_13 = arith.constant 0 : index
    %18 = vector.load %arg6[%c0_12, %c0_13] : memref<384x128xbf16, #tpu.memory_space<vmem>>, vector<384x128xbf16>
    %cst_14 = arith.constant dense<0.000000e+00> : vector<8x128xf32>
    %19 = tpu.matmul %17, %18, %cst_14 {dimension_numbers = #tpu.dot_dimension_numbers<[1], [0], [0], [1], [0, 0, 1, 1], [], []>} : vector<8x384xbf16>, vector<384x128xbf16>, vector<8x128xf32> -> vector<8x128xf32>
    %c0_15 = arith.constant 0 : index
    %c0_16 = arith.constant 0 : index
    %20 = vector.load %arg7[%c0_15, %c0_16] : memref<1x128xf32, #tpu.memory_space<vmem>>, vector<1x128xf32>
    %21 = vector.broadcast %20 : vector<1x128xf32> to vector<8x128xf32>
    %22 = arith.addf %19, %21 : vector<8x128xf32>
    %23 = math.tanh %22 : vector<8x128xf32>
    %cst_17 = arith.constant 2.000000e+00 : f32
    %24 = vector.broadcast %cst_17 : f32 to vector<8x128xf32>
    %25 = arith.mulf %23, %24 : vector<8x128xf32>
    %c0_18 = arith.constant 0 : index
    %c0_19 = arith.constant 0 : index
    %26 = vector.load %arg8[%c0_18, %c0_19] : memref<8x128xf32, #tpu.memory_space<vmem>>, vector<8x128xf32>
    tpu.vector_store %arg8[%c0_18, %c0_19], %25 {strides = array<i32>} : memref<8x128xf32, #tpu.memory_space<vmem>>, vector<8x128xf32>,
    return
  }
  func.func @transform_0(%arg0: i32) -> (i32, i32) {
    %c0_i32 = arith.constant 0 : i32
    %c0_i32_0 = arith.constant 0 : i32
    return %arg0, %c0_i32 : i32, i32
  }
  func.func @transform_1(%arg0: i32) -> (i32, i32) {
    %c0_i32 = arith.constant 0 : i32
    %c0_i32_0 = arith.constant 0 : i32
    %c0_i32_1 = arith.constant 0 : i32
    return %c0_i32, %c0_i32_0 : i32, i32
  }
  func.func @transform_2(%arg0: i32) -> (i32, i32) {
    %c0_i32 = arith.constant 0 : i32
    %c0_i32_0 = arith.constant 0 : i32
    %c0_i32_1 = arith.constant 0 : i32
    return %c0_i32, %c0_i32_0 : i32, i32
  }
  func.func @transform_3(%arg0: i32) -> (i32, i32) {
    %c0_i32 = arith.constant 0 : i32
    %c0_i32_0 = arith.constant 0 : i32
    %c0_i32_1 = arith.constant 0 : i32
    return %c0_i32, %c0_i32_0 : i32, i32
  }
  func.func @transform_4(%arg0: i32) -> (i32, i32) {
    %c0_i32 = arith.constant 0 : i32
    %c0_i32_0 = arith.constant 0 : i32
    %c0_i32_1 = arith.constant 0 : i32
    return %c0_i32, %c0_i32_0 : i32, i32
  }
  func.func @transform_5(%arg0: i32) -> (i32, i32) {
    %c0_i32 = arith.constant 0 : i32
    %c0_i32_0 = arith.constant 0 : i32
    %c0_i32_1 = arith.constant 0 : i32
    return %c0_i32, %c0_i32_0 : i32, i32
  }
  func.func @transform_6(%arg0: i32) -> (i32, i32) {
    %c0_i32 = arith.constant 0 : i32
    %c0_i32_0 = arith.constant 0 : i32
    %c0_i32_1 = arith.constant 0 : i32
    return %c0_i32, %c0_i32_0 : i32, i32
  }
  func.func @transform_7(%arg0: i32) -> (i32, i32) {
    %c0_i32 = arith.constant 0 : i32
    %c0_i32_0 = arith.constant 0 : i32
    return %arg0, %c0_i32 : i32, i32
  }
}

</mosaic_0001>

<bundles_post_ra>
// kernel: tpu_custom_call.1
= control target key start
LH: loop header
LB: loop body
LE: loop exit
PB: predicated region body
PF: predicated region fallthrough
CT: control target
= control target key end

     0   :  { %12 = vsyncpa [#allocation3], 0  ;;  %s2048_s0 = inlined_call_operand.hbm [shape: f32[8,32], index: 0, kind: input, shape index: {}]   ;;  %s2049_s1 = inlined_call_operand.hbm [shape: bf16[32,512], index: 1, kind: input, shape index: {}]   ;;  %s2050_s2 = inlined_call_operand.vmem [shape: f32[1,512], index: 2, kind: input, shape index: {}]   ;;  %s2051_s3 = inlined_call_operand.hbm [shape: bf16[512,384], index: 3, kind: input, shape index: {}]   ;;  %s2052_s4 = inlined_call_operand.vmem [shape: f32[1,384], index: 4, kind: input, shape index: {}]   ;;  %s2053_s5 = inlined_call_operand.hbm [shape: bf16[384,128], index: 5, kind: input, shape index: {}]   ;;  %s2054_s6 = inlined_call_operand.vmem [shape: f32[1,128], index: 6, kind: input, shape index: {}]   ;;  %s2055_s7 = inlined_call_operand.hbm [shape: f32[8,128], index: 7, kind: output, shape index: {}]  }
   0x1   :  { %13 = vsyncpa [#allocation6], 0 }
   0x2   :  { %14 = vsyncpa [#allocation9], 0 }
   0x3   :  { %15 = vsyncpa [#allocation4], 0  ;;  %s1901_s24 = smov [#allocation5]   ;;  %s1783_s28 = scalar_lea.hbm %s2049_s1, 1024 }
   0x4   :  { %s31_s25 = sshll.u32 %s1901_s24, 4  ;;  %p1784_p0 = scmp.ne.s32.totalorder %s2049_s1, %s1783_s28  ;;  %s32_s25 = int_to_ptr.vmem [resolvable:$true] %s31_s25 }
   0x5   :  { %p1787_p1 = scmp.lt.u32.totalorder %s1783_s28, %s2049_s1 }
   0x7   :  { %p1789_p2 = pnand %p1787_p1, %p1784_p0 }
   0x9   :  { %1792 = shalt.err (!%p1789_p2)
}
   0xa   :  { %s1793_s10 = scalar_lea.vmem %s32_s25, 1024  ;;  %p1798_p4 = scmp.lt.s32.totalorder %s32_s25, %s32_s25 }
   0xb   :  { %p1794_p3 = scmp.ne.s32.totalorder %s32_s25, %s1793_s10  ;;  %p1799_p5 = scmp.lt.s32.totalorder %s1793_s10, %s1793_s10 }
   0xd   :  { %p1800_p6 = por %p1799_p5, %p1798_p4 }
   0xf   :  { %p1801_p7 = pnand %p1800_p6, %p1794_p3 }
  0x11   :  { %1804 = shalt.err (!%p1801_p7)
}
  0x12   :  { %s1902_s11 = smov 256   ;;  %s1903_s12 = smov 16  }
  0x13   :  { %37 = dma.hbm_to_vmem [thread:$0]  %s2049_s1, 1024, %s32_s25, [#allocation6], %s1902_s11, %s1902_s11, %s1903_s12  }
  0x14   :  { %s1904_s15 = smov [#allocation2]   ;;  %s1905_s17 = smov [#allocation7]  }
  0x15   :  { %s22_s16 = sshll.u32 %s1904_s15, 4  ;;  %s45_s18 = sshll.u32 %s1905_s17, 4  ;;  %s23_s16 = int_to_ptr.vmem [resolvable:$true] %s22_s16  ;;  %s46_s18 = int_to_ptr.vmem [resolvable:$true] %s45_s18 }
  0x16   :  { %s1805_s21 = scalar_lea.hbm %s2048_s0, 128 }
  0x17   :  { %p1806_p8 = scmp.ne.s32.totalorder %s2048_s0, %s1805_s21  ;;  %p1809_p9 = scmp.lt.u32.totalorder %s1805_s21, %s2048_s0 }
  0x19   :  { %p1811_p10 = pnand %p1809_p9, %p1806_p8 }
  0x1b   :  { %1814 = shalt.err (!%p1811_p10)
}
  0x1c   :  { %s1815_s1 = scalar_lea.vmem %s23_s16, 128  ;;  %p1820_p12 = scmp.lt.s32.totalorder %s23_s16, %s23_s16 }
  0x1d   :  { %p1816_p11 = scmp.ne.s32.totalorder %s23_s16, %s1815_s1  ;;  %p1821_p13 = scmp.lt.s32.totalorder %s1815_s1, %s1815_s1 }
  0x1f   :  { %p1822_p0 = por %p1821_p13, %p1820_p12 }
  0x21   :  { %p1823_p1 = pnand %p1822_p0, %p1816_p11 }
  0x23   :  { %1826 = shalt.err (!%p1823_p1)
}
  0x24   :  { %25 = dma.hbm_to_vmem [thread:$0]  %s2048_s0, 128, %s23_s16, [#allocation3]  }
  0x25   :  { %s1827_s30 = scalar_lea.hbm %s2051_s3, 12288 }
  0x26   :  { %p1828_p2 = scmp.ne.s32.totalorder %s2051_s3, %s1827_s30  ;;  %p1831_p3 = scmp.lt.u32.totalorder %s1827_s30, %s2051_s3 }
  0x28   :  { %p1833_p4 = pnand %p1831_p3, %p1828_p2 }
  0x2a   :  { %1836 = shalt.err (!%p1833_p4)
}
  0x2b   :  { %s1837_s12 = scalar_lea.vmem %s46_s18, 12288  ;;  %p1842_p6 = scmp.lt.s32.totalorder %s46_s18, %s46_s18 }
  0x2c   :  { %p1838_p5 = scmp.ne.s32.totalorder %s46_s18, %s1837_s12  ;;  %p1843_p7 = scmp.lt.s32.totalorder %s1837_s12, %s1837_s12 }
  0x2e   :  { %p1844_p8 = por %p1843_p7, %p1842_p6 }
  0x30   :  { %p1845_p9 = pnand %p1844_p8, %p1838_p5 }
  0x32   :  { %1848 = shalt.err (!%p1845_p9)
}
  0x33   :  { %s1906_s0 = smov 192   ;;  %s1907_s13 = smov 12  }
  0x34   :  { %51 = dma.hbm_to_vmem [thread:$0]  %s2051_s3, 12288, %s46_s18, [#allocation6], %s1906_s0, %s1906_s0, %s1907_s13  }
  0x35   :  { %s1908_s16 = smov [#allocation8]   ;;  %s1849_s21 = scalar_lea.hbm %s2053_s5, 3072 }
  0x36   :  { %s59_s17 = sshll.u32 %s1908_s16, 4  ;;  %p1850_p10 = scmp.ne.s32.totalorder %s2053_s5, %s1849_s21  ;;  %s60_s17 = int_to_ptr.vmem [resolvable:$true] %s59_s17 }
  0x37   :  { %p1853_p11 = scmp.lt.u32.totalorder %s1849_s21, %s2053_s5 }
  0x39   :  { %p1855_p12 = pnand %p1853_p11, %p1850_p10 }
  0x3b   :  { %1858 = shalt.err (!%p1855_p12)
}
  0x3c   :  { %s1859_s1 = scalar_lea.vmem %s60_s17, 3072  ;;  %p1864_p0 = scmp.lt.s32.totalorder %s60_s17, %s60_s17 }
  0x3d   :  { %p1860_p13 = scmp.ne.s32.totalorder %s60_s17, %s1859_s1  ;;  %p1865_p1 = scmp.lt.s32.totalorder %s1859_s1, %s1859_s1 }
  0x3f   :  { %p1866_p2 = por %p1865_p1, %p1864_p0 }
  0x41   :  { %p1867_p3 = pnand %p1866_p2, %p1860_p13 }
  0x43   :  { %1870 = shalt.err (!%p1867_p3)
}
  0x44   :  { %s1909_s3 = smov 64   ;;  %s1910_s18 = smov 4  }
  0x45   :  { %65 = dma.hbm_to_vmem [thread:$0]  %s2053_s5, 3072, %s60_s17, [#allocation9], %s1909_s3, %s1909_s3, %s1910_s18  }
  0x46   :  { %1893 = dma.done.wait [#allocation3], 128  }
  0x47   :  { %1894 = vsyncadd [#allocation3], 4294967168 }
  0x48   :  { %1895 = dma.done.wait [#allocation6], 13312  }
  0x49   :  { %1896 = vsyncadd [#allocation6], 4294953984 }
  0x4a   :  { %1897 = dma.done.wait [#allocation9], 3072  }
  0x4b   :  { %1898 = vsyncadd [#allocation9], 4294964224  ;;  %v1911_v0 = vmov 0   ;;  %v1617_v1 = vld [vmem:[#allocation5 + $0x4] ss:$16 sps:$4 sm:$0xff]   ;;  %v81_v5 = vld [vmem:[#allocation2] sm:$0xff]  ;;  %v93_v61 = vlaneseq }
  0x4c   :  { %189 = vmatprep.mubr.bf16.mxu0 %v1911_v0  ;;  %230 = vmatprep.mubr.bf16.mxu1 %v1911_v0  ;;  %v1619_v2 = vld [vmem:[#allocation5] ss:$16 sps:$4 sm:$0xff]   ;;  %v1620_v3 = vld [vmem:[#allocation5 + $0x24] ss:$16 sps:$4 sm:$0xff]   ;;  %v1623_v6 = vld [vmem:[#allocation5 + $0xc] ss:$16 sps:$4 sm:$0xff]   ;;  %v82_v9 = vpack.c.bf16 %v81_v5, %v81_v5 }
  0x4d   :  { %157 = vmatprep.subr.bf16.mxu0 %v1617_v1  ;;  %v1622_v4 = vld [vmem:[#allocation5 + $0x20] ss:$16 sps:$4 sm:$0xff]   ;;  %v1625_v7 = vld [vmem:[#allocation5 + $0x8] ss:$16 sps:$4 sm:$0xff]   ;;  %198 = vmatprep.subr.bf16.mxu1 %v1623_v6  ;;  %v1626_v8 = vld [vmem:[#allocation5 + $0x2c] ss:$16 sps:$4 sm:$0xff]  }
  0x4e   :  { %158 = vmatpush1.bf16.msra.mxu0 %v1619_v2  ;;  %199 = vmatpush1.bf16.msra.mxu1 %v1625_v7  ;;  %v1628_v10 = vld [vmem:[#allocation5 + $0x28] ss:$16 sps:$4 sm:$0xff]   ;;  %v1631_v11 = vld [vmem:[#allocation7 + $0x4] ss:$12 sps:$4 sm:$0xff]   ;;  %vm153_vm0 = vcmask 261120   ;;  %v2003_v62 = vshrl.u32 %v93_v61, 7 }
  0x4f   :  { %159 = vmatprep.subr.bf16.mxu0 %v1620_v3  ;;  %200 = vmatprep.subr.bf16.mxu1 %v1626_v8  ;;  %v1629_v12 = vld [vmem:[#allocation7] ss:$12 sps:$4 sm:$0xff]   ;;  %v1634_v13 = vld [vmem:[#allocation7 + $0x1c] ss:$12 sps:$4 sm:$0xff]   ;;  %v1632_v14 = vld [vmem:[#allocation7 + $0x18] ss:$12 sps:$4 sm:$0xff]  }
  0x50   :  { %v1637_v15 = vld [vmem:[#allocation7 + $0x34] ss:$12 sps:$4 sm:$0xff]   ;;  %v1635_v16 = vld [vmem:[#allocation7 + $0x30] ss:$12 sps:$4 sm:$0xff]   ;;  %v1640_v17 = vld [vmem:[#allocation7 + $0x4c] ss:$12 sps:$4 sm:$0xff]  }
  0x51   :  { %v1638_v18 = vld [vmem:[#allocation7 + $0x48] ss:$12 sps:$4 sm:$0xff]   ;;  %v1643_v21 = vld [vmem:[#allocation7 + $0x64] ss:$12 sps:$4 sm:$0xff]   ;;  %v1661_v22 = vld [vmem:[#allocation7 + $0xe0] ss:$12 sps:$4 sm:$0xff]  }
  0x52   :  { %160 = vmatpush1.bf16.msra.mxu0 %v1622_v4  ;;  %201 = vmatpush1.bf16.msra.mxu1 %v1628_v10  ;;  %v1656_v19 = vld [vmem:[#allocation7 + $0xc8] ss:$12 sps:$4 sm:$0xff]   ;;  %v1662_v23 = vld [vmem:[#allocation7 + $0x20] ss:$12 sps:$4 sm:$0xff]   ;;  %v1666_v26 = vld [vmem:[#allocation7 + $0xf8] ss:$12 sps:$4 sm:$0xff]  }
  0x53   :  { %904 = vmatprep.subr.bf16.mxu0 %v1631_v11  ;;  %v1657_v20 = vld [vmem:[#allocation7 + $0x8] ss:$12 sps:$4 sm:$0xff]   ;;  %1502 = vmatprep.subr.bf16.mxu1 %v1656_v19  ;;  %v1641_v24 = vld [vmem:[#allocation7 + $0x60] ss:$12 sps:$4 sm:$0xff]   ;;  %v1667_v27 = vld [vmem:[#allocation7 + $0x38] ss:$12 sps:$4 sm:$0xff]  }
  0x54   :  { %v1646_v25 = vld [vmem:[#allocation7 + $0x7c] ss:$12 sps:$4 sm:$0xff]   ;;  %v1644_v28 = vld [vmem:[#allocation7 + $0x78] ss:$12 sps:$4 sm:$0xff]   ;;  %v1649_v29 = vld [vmem:[#allocation7 + $0x94] ss:$12 sps:$4 sm:$0xff]  }
  0x55   :  { %1379 = vmatmul.mubr.msk.bf16.vlgmr.msra.gmra.mrb[0].mxu0 %vm153_vm0, %v82_v9  ;;  %1380 = vmatmul.mubr.msk.bf16.vlgmr.msra.gmra.mrb[0].mxu1 %vm153_vm0, %v82_v9  ;;  %v1671_v30 = vld [vmem:[#allocation7 + $0x110] ss:$12 sps:$4 sm:$0xff]   ;;  %v1676_v33 = vld [vmem:[#allocation7 + $0x128] ss:$12 sps:$4 sm:$0xff]   ;;  %v1652_v34 = vld [vmem:[#allocation7 + $0xac] ss:$12 sps:$4 sm:$0xff]  }
  0x56   :  { %905 = vmatpush1.bf16.msra.mxu0 %v1629_v12  ;;  %1503 = vmatpush3.bf16.msra.mxu1 %v1657_v20  ;;  %v1672_v31 = vld [vmem:[#allocation7 + $0x50] ss:$12 sps:$4 sm:$0xff]   ;;  %v1677_v35 = vld [vmem:[#allocation7 + $0x68] ss:$12 sps:$4 sm:$0xff]   ;;  %v1681_v37 = vld [vmem:[#allocation7 + $0x140] ss:$12 sps:$4 sm:$0xff]  }
  0x57   :  { %906 = vmatprep.subr.bf16.mxu0 %v1634_v13  ;;  %1504 = vmatprep.subr.bf16.mxu1 %v1661_v22  ;;  %v1647_v32 = vld [vmem:[#allocation7 + $0x90] ss:$12 sps:$4 sm:$0xff]   ;;  %v1650_v36 = vld [vmem:[#allocation7 + $0xa8] ss:$12 sps:$4 sm:$0xff]   ;;  %v1682_v39 = vld [vmem:[#allocation7 + $0x80] ss:$12 sps:$4 sm:$0xff]  }
  0x58   :  { %v1655_v38 = vld [vmem:[#allocation7 + $0xc4] ss:$12 sps:$4 sm:$0xff]   ;;  %v1653_v40 = vld [vmem:[#allocation7 + $0xc0] ss:$12 sps:$4 sm:$0xff]   ;;  %v1660_v41 = vld [vmem:[#allocation7 + $0xdc] ss:$12 sps:$4 sm:$0xff]  }
  0x59   :  { %v1658_v42 = vld [vmem:[#allocation7 + $0xd8] ss:$12 sps:$4 sm:$0xff]   ;;  %v1665_v43 = vld [vmem:[#allocation7 + $0xf4] ss:$12 sps:$4 sm:$0xff]   ;;  %v1663_v44 = vld [vmem:[#allocation7 + $0xf0] ss:$12 sps:$4 sm:$0xff]  }
  0x5a   :  { %907 = vmatpush1.bf16.msra.mxu0 %v1632_v14  ;;  %1505 = vmatpush3.bf16.msra.mxu1 %v1662_v23  ;;  %v1670_v45 = vld [vmem:[#allocation7 + $0x10c] ss:$12 sps:$4 sm:$0xff]   ;;  %v1668_v46 = vld [vmem:[#allocation7 + $0x108] ss:$12 sps:$4 sm:$0xff]   ;;  %v1675_v47 = vld [vmem:[#allocation7 + $0x124] ss:$12 sps:$4 sm:$0xff]  }
  0x5b   :  { %908 = vmatprep.subr.bf16.mxu0 %v1637_v15  ;;  %1506 = vmatprep.subr.bf16.mxu1 %v1666_v26  ;;  %v1673_v48 = vld [vmem:[#allocation7 + $0x120] ss:$12 sps:$4 sm:$0xff]   ;;  %v1680_v49 = vld [vmem:[#allocation7 + $0x13c] ss:$12 sps:$4 sm:$0xff]   ;;  %v1678_v50 = vld [vmem:[#allocation7 + $0x138] ss:$12 sps:$4 sm:$0xff]  }
  0x5c   :  { %v1685_v51 = vld [vmem:[#allocation7 + $0x154] ss:$12 sps:$4 sm:$0xff]   ;;  %v1686_v52 = vld [vmem:[#allocation7 + $0x158] ss:$12 sps:$4 sm:$0xff]   ;;  %v1683_v53 = vld [vmem:[#allocation7 + $0x150] ss:$12 sps:$4 sm:$0xff]  }
  0x5d   :  { %v1687_v54 = vld [vmem:[#allocation7 + $0x98] ss:$12 sps:$4 sm:$0xff]   ;;  %v1691_v56 = vld [vmem:[#allocation7 + $0x170] ss:$12 sps:$4 sm:$0xff]   ;;  %v1688_v57 = vld [vmem:[#allocation7 + $0x168] ss:$12 sps:$4 sm:$0xff]  }
  0x5e   :  { %909 = vmatpush1.bf16.msra.mxu0 %v1635_v16  ;;  %1507 = vmatpush3.bf16.msra.mxu1 %v1667_v27  ;;  %v1690_v55 = vld [vmem:[#allocation7 + $0x16c] ss:$12 sps:$4 sm:$0xff]   ;;  %v1692_v58 = vld [vmem:[#allocation7 + $0xb0] ss:$12 sps:$4 sm:$0xff]   ;;  %v1696_v60 = vld [vmem:[#allocation7 + $0x248] ss:$12 sps:$4 sm:$0xff]  }
  0x5f   :  { %910 = vmatprep.subr.bf16.mxu0 %v1640_v17  ;;  %1508 = vmatprep.subr.bf16.mxu1 %v1671_v30  ;;  %v1695_v59 = vld [vmem:[#allocation7 + $0x184] ss:$12 sps:$4 sm:$0xff]   ;;  %v95_v63 = vsub.s32 0, %v2003_v62  ;;  %v2009_v0 = vld [vmem:[%s2050_s2] sm:$0xf]  ;;  %v99_v1 = vsub.s32 1, %v2003_v62 }
  0x60   :  { %v107_v3 = vsub.s32 3, %v2003_v62  ;;  %v1693_v19 = vld [vmem:[#allocation7 + $0x180] ss:$12 sps:$4 sm:$0xff]   ;;  %v1697_v20 = vld [vmem:[#allocation7 + $0x188] ss:$12 sps:$4 sm:$0xff]   ;;  %vm1913_vm1 = vmmov 0  }
  0x61   :  { %v96_v2 = vrot.slane %v2009_v0, %v95_v63  ;;  %v100_v4 = vrot.slane %v2009_v0, %v99_v1  ;;  %v1700_v23 = vld [vmem:[#allocation7 + $0x19c] ss:$12 sps:$4 sm:$0xff]   ;;  %v1698_v27 = vld [vmem:[#allocation7 + $0x198] ss:$12 sps:$4 sm:$0xff]   ;;  %s1914_s8 = smov [#allocation10]  }
  0x62   :  { %911 = vmatpush1.bf16.msra.mxu0 %v1638_v18  ;;  %1509 = vmatpush3.bf16.msra.mxu1 %v1672_v31  ;;  %v108_v8 = vrot.slane %v2009_v0, %v107_v3  ;;  %v1706_v30 = vld [vmem:[#allocation7 + $0x278] ss:$12 sps:$4 sm:$0xff]   ;;  %v1703_v31 = vld [vmem:[#allocation7 + $0x1b0] ss:$12 sps:$4 sm:$0xff]   ;;  %s1360_s9 = sshll.u32 %s1914_s8, 4  ;;  %s1361_s9 = int_to_ptr.vmem [resolvable:$true] %s1360_s9 }
  0x63   :  { %912 = vmatprep.subr.bf16.mxu0 %v1643_v21  ;;  %1510 = vmatprep.subr.bf16.mxu1 %v1676_v33  ;;  %v1710_v33 = vld [vmem:[#allocation7 + $0x1cc] ss:$12 sps:$4 sm:$0xff]   ;;  %s1871_s10 = scalar_lea.vmem %s1361_s9, 128  ;;  %p1876_p5 = scmp.lt.s32.totalorder %s1361_s9, %s1361_s9 }
  0x64   :  { %v1736_v61 = vld [vmem:[#allocation7 + $0x258] ss:$12 sps:$4 sm:$0xff]   ;;  %p1872_p4 = scmp.ne.s32.totalorder %s1361_s9, %s1871_s10  ;;  %p1877_p6 = scmp.lt.s32.totalorder %s1871_s10, %s1871_s10 }
  0x65   :  { %v1744_v3 = vld [vmem:[#allocation7 + $0x28c] ss:$12 sps:$4 sm:$0xff]  }
  0x66   :  { %913 = vmatpush1.bf16.msra.mxu0 %v1641_v24  ;;  %1511 = vmatpush3.bf16.msra.mxu1 %v1677_v35  ;;  %v1701_v24 = vld [vmem:[#allocation7 + $0x260] ss:$12 sps:$4 sm:$0xff]   ;;  %v1708_v35 = vld [vmem:[#allocation7 + $0x1c8] ss:$12 sps:$4 sm:$0xff]   ;;  %p1878_p7 = por %p1877_p6, %p1876_p5 }
  0x67   :  { %914 = vmatprep.subr.bf16.mxu0 %v1646_v25  ;;  %1512 = vmatprep.subr.bf16.mxu1 %v1681_v37  ;;  %v1715_v37 = vld [vmem:[#allocation7 + $0x1e4] ss:$12 sps:$4 sm:$0xff]  }
  0x68   :  { %p1879_p8 = pnand %p1878_p7, %p1872_p4 }
  0x6a   :  { %915 = vmatpush1.bf16.msra.mxu0 %v1644_v28  ;;  %1513 = vmatpush3.bf16.msra.mxu1 %v1682_v39  ;;  %v1702_v28 = vld [vmem:[#allocation7 + $0x1a0] ss:$12 sps:$4 sm:$0xff]   ;;  %v103_v39 = vsub.s32 2, %v2003_v62  ;;  %v1775_v62 = vld [vmem:[#allocation8 + $0x90] sm:$0xff]  }
  0x6b   :  { %916 = vmatprep.subr.bf16.mxu0 %v1649_v29  ;;  %1514 = vmatprep.subr.bf16.mxu1 %v1686_v52  ;;  %v1705_v29 = vld [vmem:[#allocation7 + $0x1b4] ss:$12 sps:$4 sm:$0xff]   ;;  %v1730_v52 = vld [vmem:[#allocation7 + $0x22c] ss:$12 sps:$4 sm:$0xff]  }
  0x6e   :  { %917 = vmatpush1.bf16.msra.mxu0 %v1647_v32  ;;  %1515 = vmatpush3.bf16.msra.mxu1 %v1687_v54  ;;  %v1707_v32 = vld [vmem:[#allocation7 + $0x1b8] ss:$12 sps:$4 sm:$0xff]  }
  0x6f   :  { %918 = vmatprep.subr.bf16.mxu0 %v1652_v34  ;;  %1516 = vmatprep.subr.bf16.mxu1 %v1691_v56  ;;  %v1711_v34 = vld [vmem:[#allocation7 + $0x290] ss:$12 sps:$4 sm:$0xff]  }
  0x70   :  { %v1732_v56 = vld [vmem:[#allocation7 + $0x230] ss:$12 sps:$4 sm:$0xff]  }
  0x72   :  { %919 = vmatpush1.bf16.msra.mxu0 %v1650_v36  ;;  %1517 = vmatpush3.bf16.msra.mxu1 %v1692_v58  ;;  %v1712_v36 = vld [vmem:[#allocation7 + $0x1d0] ss:$12 sps:$4 sm:$0xff]  }
  0x73   :  { %920 = vmatprep.subr.bf16.mxu0 %v1655_v38  ;;  %1524 = vmatprep.subr.bf16.mxu1 %v1696_v60  ;;  %v1716_v38 = vld [vmem:[#allocation7 + $0x2a8] ss:$12 sps:$4 sm:$0xff]  }
  0x74   :  { %v1738_v60 = vld [vmem:[#allocation7 + $0x25c] ss:$12 sps:$4 sm:$0xff]  }
  0x76   :  { %921 = vmatpush1.bf16.msra.mxu0 %v1653_v40  ;;  %v1713_v40 = vld [vmem:[#allocation7 + $0x1e0] ss:$12 sps:$4 sm:$0xff]  }
  0x77   :  { %922 = vmatprep.subr.bf16.mxu0 %v1660_v41  ;;  %v1717_v41 = vld [vmem:[#allocation7 + $0x1e8] ss:$12 sps:$4 sm:$0xff]  }
  0x7a   :  { %923 = vmatpush1.bf16.msra.mxu0 %v1658_v42  ;;  %v1720_v42 = vld [vmem:[#allocation7 + $0x1fc] ss:$12 sps:$4 sm:$0xff]  }
  0x7b   :  { %924 = vmatprep.subr.bf16.mxu0 %v1665_v43  ;;  %v1721_v43 = vld [vmem:[#allocation7 + $0x2c0] ss:$12 sps:$4 sm:$0xff]  }
  0x7e   :  { %925 = vmatpush1.bf16.msra.mxu0 %v1663_v44  ;;  %v104_v44 = vrot.slane %v2009_v0, %v103_v39  ;;  %v1741_v0 = vld [vmem:[#allocation7 + $0x274] ss:$12 sps:$4 sm:$0xff]  }
  0x7f   :  { %926 = vmatprep.subr.bf16.mxu0 %v1670_v45  ;;  %v1718_v45 = vld [vmem:[#allocation7 + $0x1f8] ss:$12 sps:$4 sm:$0xff]  }
  0x82   :  { %927 = vmatpush1.bf16.msra.mxu0 %v1668_v46  ;;  %v1722_v46 = vld [vmem:[#allocation7 + $0x200] ss:$12 sps:$4 sm:$0xff]  }
  0x83   :  { %928 = vmatprep.subr.bf16.mxu0 %v1675_v47  ;;  %v1725_v47 = vld [vmem:[#allocation7 + $0x214] ss:$12 sps:$4 sm:$0xff]  }
  0x86   :  { %929 = vmatpush1.bf16.msra.mxu0 %v1673_v48  ;;  %v1726_v48 = vld [vmem:[#allocation7 + $0x2d8] ss:$12 sps:$4 sm:$0xff]  }
  0x87   :  { %930 = vmatprep.subr.bf16.mxu0 %v1680_v49 }
  0x8a   :  { %931 = vmatpush1.bf16.msra.mxu0 %v1678_v50  ;;  %v1723_v50 = vld [vmem:[#allocation7 + $0x210] ss:$12 sps:$4 sm:$0xff]  }
  0x8b   :  { %932 = vmatprep.subr.bf16.mxu0 %v1685_v51  ;;  %v1727_v51 = vld [vmem:[#allocation7 + $0x218] ss:$12 sps:$4 sm:$0xff]  }
  0x8e   :  { %933 = vmatpush1.bf16.msra.mxu0 %v1683_v53  ;;  %v1731_v53 = vld [vmem:[#allocation7 + $0x2f0] ss:$12 sps:$4 sm:$0xff]  }
  0x8f   :  { %934 = vmatprep.subr.bf16.mxu0 %v1690_v55  ;;  %v1728_v55 = vld [vmem:[#allocation7 + $0x228] ss:$12 sps:$4 sm:$0xff]  }
  0x92   :  { %935 = vmatpush1.bf16.msra.mxu0 %v1688_v57  ;;  %v1735_v57 = vld [vmem:[#allocation7 + $0x244] ss:$12 sps:$4 sm:$0xff]  }
  0x93   :  { %945 = vmatprep.subr.bf16.mxu0 %v1695_v59  ;;  %v1733_v59 = vld [vmem:[#allocation7 + $0x240] ss:$12 sps:$4 sm:$0xff]  }
 0x128   :  { %v191_v5 = vpop.f32.mrb[0].mxu0  ;;  %v232_v13 = vpop.f32.mrb[0].mxu1 }
 0x129   :  { %v192_v6 = vadd.f32 %v191_v5, %v96_v2  ;;  %v193_v7 = vpop.f32.mrb[1].mxu0  ;;  %v234_v15 = vpop.f32.mrb[1].mxu1  ;;  %v233_v49 = vadd.f32 %v232_v13, %v104_v44  ;;  %v1739_v2 = vld [vmem:[#allocation7 + $0x270] ss:$12 sps:$4 sm:$0xff]   ;;  %v1757_v13 = vld [vmem:[#allocation8 + $0x40] sm:$0xff]  }
 0x12a   :  { %v194_v9 = vadd.f32 %v193_v7, %v100_v4  ;;  %v195_v10 = vpop.f32.mrb[2].mxu0  ;;  %v235_v16 = vadd.f32 %v234_v15, %v108_v8  ;;  %v236_v17 = vpop.f32.mrb[2].mxu1  ;;  %v1742_v4 = vld [vmem:[#allocation7 + $0x288] ss:$12 sps:$4 sm:$0xff]   ;;  %v1747_v5 = vld [vmem:[#allocation7 + $0x2a4] ss:$12 sps:$4 sm:$0xff]  }
 0x12b   :  { %v239_v11 = vmax.f32 %v192_v6, 0.0  ;;  %v196_v12 = vpop.f32.mrb[3].mxu0  ;;  %v237_v21 = vpop.f32.mrb[3].mxu1  ;;  %v241_v54 = vmax.f32 %v233_v49, 0.0  ;;  %v1745_v6 = vld [vmem:[#allocation7 + $0x2a0] ss:$12 sps:$4 sm:$0xff]  }
 0x12c   :  { %v240_v14 = vmax.f32 %v194_v9, 0.0  ;;  %v242_v25 = vmax.f32 %v235_v16, 0.0  ;;  %v1750_v7 = vld [vmem:[#allocation7 + $0x2bc] ss:$12 sps:$4 sm:$0xff]   ;;  %v1748_v8 = vld [vmem:[#allocation7 + $0x2b8] ss:$12 sps:$4 sm:$0xff]  }
 0x12d   :  { %v243_v22 = vpack.c.bf16 %v239_v11, %v239_v11  ;;  %v245_v58 = vpack.c.bf16 %v241_v54, %v241_v54  ;;  %v1753_v9 = vld [vmem:[#allocation7 + $0x2d4] ss:$12 sps:$4 sm:$0xff]   ;;  %v1751_v10 = vld [vmem:[#allocation7 + $0x2d0] ss:$12 sps:$4 sm:$0xff]   ;;  %v1756_v11 = vld [vmem:[#allocation7 + $0x2ec] ss:$12 sps:$4 sm:$0xff]  }
 0x12e   :  { %v244_v18 = vpack.c.bf16 %v240_v14, %v240_v14  ;;  %v246_v26 = vpack.c.bf16 %v242_v25, %v242_v25  ;;  %v1754_v12 = vld [vmem:[#allocation7 + $0x2e8] ss:$12 sps:$4 sm:$0xff]   ;;  %v1758_v14 = vld [vmem:[#allocation8] sm:$0xff]  }
 0x12f   :  { %v1759_v15 = vld [vmem:[#allocation8 + $0x48] sm:$0xff]   ;;  %v1761_v17 = vld [vmem:[#allocation8 + $0x50] sm:$0xff]   ;;  %v1765_v21 = vld [vmem:[#allocation8 + $0x60] sm:$0xff]  }
 0x130   :  { %936 = vmatprep.mubr.bf16.mxu0 %v244_v18  ;;  %1018 = vmatprep.mubr.bf16.mxu1 %v244_v18  ;;  %v1760_v16 = vld [vmem:[#allocation8 + $0x8] sm:$0xff]   ;;  %v1762_v18 = vld [vmem:[#allocation8 + $0x10] sm:$0xff]  }
 0x131   :  { %937 = vmatmul.mubr.bf16.vlgmr.msra.gmra.mrb[4].mxu0 %v243_v22  ;;  %1019 = vmatmul.mubr.bf16.vlgmr.msra.gmra.mrb[4].mxu1 %v243_v22  ;;  %v1766_v22 = vld [vmem:[#allocation8 + $0x20] sm:$0xff]   ;;  %v1769_v25 = vld [vmem:[#allocation8 + $0x70] sm:$0xff]  }
 0x132   :  { %946 = vmatpush1.bf16.msra.mxu0 %v1693_v19  ;;  %1525 = vmatpush3.bf16.msra.mxu1 %v1697_v20  ;;  %v1763_v19 = vld [vmem:[#allocation8 + $0x58] sm:$0xff]  }
 0x133   :  { %947 = vmatprep.subr.bf16.mxu0 %v1700_v23  ;;  %1526 = vmatprep.subr.bf16.mxu1 %v1701_v24  ;;  %v1764_v20 = vld [vmem:[#allocation8 + $0x18] sm:$0xff]   ;;  %v1767_v23 = vld [vmem:[#allocation8 + $0x68] sm:$0xff]  }
 0x134   :  { %1058 = vmatprep.mubr.bf16.mxu1 %v246_v26  ;;  %977 = vmatprep.mubr.bf16.mxu0 %v246_v26  ;;  %v1768_v24 = vld [vmem:[#allocation8 + $0x28] sm:$0xff]   ;;  %v1770_v26 = vld [vmem:[#allocation8 + $0x30] sm:$0xff]  }
 0x136   :  { %948 = vmatpush1.bf16.msra.mxu0 %v1698_v27  ;;  %1527 = vmatpush3.bf16.msra.mxu1 %v1702_v28  ;;  %v1771_v27 = vld [vmem:[#allocation8 + $0x78] sm:$0xff]  }
 0x137   :  { %949 = vmatprep.subr.bf16.mxu0 %v1705_v29  ;;  %1528 = vmatprep.subr.bf16.mxu1 %v1706_v30  ;;  %v1772_v28 = vld [vmem:[#allocation8 + $0x38] sm:$0xff]   ;;  %v1912_v29 = vmov 0.0  }
 0x13a   :  { %950 = vmatpush1.bf16.msra.mxu0 %v1703_v31  ;;  %1529 = vmatpush3.bf16.msra.mxu1 %v1707_v32 }
 0x13b   :  { %951 = vmatprep.subr.bf16.mxu0 %v1710_v33  ;;  %1530 = vmatprep.subr.bf16.mxu1 %v1711_v34 }
 0x13e   :  { %952 = vmatpush1.bf16.msra.mxu0 %v1708_v35  ;;  %1531 = vmatpush3.bf16.msra.mxu1 %v1712_v36  ;;  %v375_v35 = vld [vmem:[%s2052_s4] sm:$0x7] }
 0x13f   :  { %953 = vmatprep.subr.bf16.mxu0 %v1715_v37  ;;  %1532 = vmatprep.subr.bf16.mxu1 %v1716_v38  ;;  %v388_v36 = vrot.slane %v375_v35, %v103_v39 }
 0x142   :  { %954 = vmatpush1.bf16.msra.mxu0 %v1713_v40  ;;  %1533 = vmatpush3.bf16.msra.mxu1 %v1717_v41 }
 0x143   :  { %955 = vmatprep.subr.bf16.mxu0 %v1720_v42  ;;  %1534 = vmatprep.subr.bf16.mxu1 %v1721_v43 }
 0x146   :  { %956 = vmatpush1.bf16.msra.mxu0 %v1718_v45  ;;  %1535 = vmatpush3.bf16.msra.mxu1 %v1722_v46  ;;  %v380_v45 = vrot.slane %v375_v35, %v95_v63  ;;  %v384_v46 = vrot.slane %v375_v35, %v99_v1  ;;  %v1776_v63 = vld [vmem:[#allocation8 + $0x98] sm:$0xff]   ;;  %v1777_v1 = vld [vmem:[#allocation8 + $0xa0] sm:$0xff]  }
 0x147   :  { %957 = vmatprep.subr.bf16.mxu0 %v1725_v47  ;;  %1536 = vmatprep.subr.bf16.mxu1 %v1726_v48 }
 0x14a   :  { %958 = vmatpush1.bf16.msra.mxu0 %v1723_v50  ;;  %1537 = vmatpush3.bf16.msra.mxu1 %v1727_v51 }
 0x14b   :  { %959 = vmatprep.subr.bf16.mxu0 %v1730_v52  ;;  %1538 = vmatprep.subr.bf16.mxu1 %v1731_v53 }
 0x14e   :  { %960 = vmatpush1.bf16.msra.mxu0 %v1728_v55  ;;  %1539 = vmatpush3.bf16.msra.mxu1 %v1732_v56  ;;  %v1773_v55 = vld [vmem:[#allocation8 + $0x80] sm:$0xff]  }
 0x14f   :  { %961 = vmatprep.subr.bf16.mxu0 %v1735_v57  ;;  %1546 = vmatprep.subr.bf16.mxu1 %v1757_v13  ;;  %v1774_v57 = vld [vmem:[#allocation8 + $0x88] sm:$0xff]  }
 0x151   :  { %1059 = vmatmul.mubr.bf16.vlgmr.msra.gmra.mrb[8].mxu1 %v245_v58 }
 0x152   :  { %962 = vmatpush1.bf16.msra.mxu0 %v1733_v59  ;;  %1547 = vmatpush3.bf16.msra.mxu1 %v1758_v14  ;;  %v1779_v59 = vld [vmem:[#allocation8 + $0xb0] sm:$0xff]  }
 0x153   :  { %963 = vmatprep.subr.bf16.mxu0 %v1738_v60  ;;  %1548 = vmatprep.subr.bf16.mxu1 %v1759_v15  ;;  %v1780_v60 = vld [vmem:[#allocation8 + $0xb8] sm:$0xff]  }
 0x156   :  { %964 = vmatpush1.bf16.msra.mxu0 %v1736_v61  ;;  %1549 = vmatpush3.bf16.msra.mxu1 %v1760_v16 }
 0x157   :  { %965 = vmatprep.subr.bf16.mxu0 %v1741_v0  ;;  %1550 = vmatprep.subr.bf16.mxu1 %v1761_v17 }
 0x15a   :  { %966 = vmatpush1.bf16.msra.mxu0 %v1739_v2  ;;  %1551 = vmatpush3.bf16.msra.mxu1 %v1762_v18 }
 0x15b   :  { %967 = vmatprep.subr.bf16.mxu0 %v1744_v3  ;;  %1552 = vmatprep.subr.bf16.mxu1 %v1763_v19 }
 0x15e   :  { %968 = vmatpush1.bf16.msra.mxu0 %v1742_v4  ;;  %1553 = vmatpush3.bf16.msra.mxu1 %v1764_v20 }
 0x15f   :  { %969 = vmatprep.subr.bf16.mxu0 %v1747_v5  ;;  %1554 = vmatprep.subr.bf16.mxu1 %v1765_v21 }
 0x162   :  { %970 = vmatpush1.bf16.msra.mxu0 %v1745_v6  ;;  %1555 = vmatpush3.bf16.msra.mxu1 %v1766_v22 }
 0x163   :  { %971 = vmatprep.subr.bf16.mxu0 %v1750_v7  ;;  %1556 = vmatprep.subr.bf16.mxu1 %v1767_v23  ;;  %v1477_v7 = vld [vmem:[%s2054_s6] ss:$0 sm:$0xff] }
 0x166   :  { %972 = vmatpush1.bf16.msra.mxu0 %v1748_v8  ;;  %1557 = vmatpush3.bf16.msra.mxu1 %v1768_v24 }
 0x167   :  { %973 = vmatprep.subr.bf16.mxu0 %v1753_v9  ;;  %1558 = vmatprep.subr.bf16.mxu1 %v1769_v25 }
 0x16a   :  { %974 = vmatpush1.bf16.msra.mxu0 %v1751_v10  ;;  %1559 = vmatpush3.bf16.msra.mxu1 %v1770_v26 }
 0x16b   :  { %975 = vmatprep.subr.bf16.mxu0 %v1756_v11  ;;  %1560 = vmatprep.subr.bf16.mxu1 %v1771_v27 }
 0x16e   :  { %976 = vmatpush1.bf16.msra.mxu0 %v1754_v12  ;;  %1561 = vmatpush3.bf16.msra.mxu1 %v1772_v28 }
 0x16f   :  { %1577 = vmatprep.subr.bf16.mxu1 %v1912_v29 }
 0x171   :  { %978 = vmatmul.mubr.bf16.vlgmr.msra.gmra.mrb[4].mxu0 %v245_v58  ;;  %v1778_v58 = vld [vmem:[#allocation8 + $0xa8] sm:$0xff]  }
 0x204   :  { %v1518_v30 = vpop.f32.mrb[4].mxu1 }
 0x205   :  { %v1519_v31 = vpop.f32.mrb[5].mxu1 }
 0x206   :  { %v1520_v32 = vadd.f32 %v1519_v31, %v1518_v30  ;;  %v1521_v33 = vpop.f32.mrb[6].mxu1 }
 0x207   :  { %v1522_v34 = vpop.f32.mrb[7].mxu1 }
 0x208   :  { %v1021_v40 = vadd.f32 %v1520_v32, %v388_v36 }
 0x224   :  { %v1540_v37 = vpop.f32.mrb[8].mxu1 }
 0x225   :  { %v1541_v38 = vpop.f32.mrb[9].mxu1 }
 0x226   :  { %v1542_v41 = vadd.f32 %v1541_v38, %v1540_v37  ;;  %v1543_v42 = vpop.f32.mrb[10].mxu1 }
 0x227   :  { %v1544_v43 = vpop.f32.mrb[11].mxu1 }
 0x228   :  { %v1061_v44 = vadd.f32 %v1542_v41, %v1021_v40 }
 0x22a   :  { %v1068_v61 = vmax.f32 %v1061_v44, 0.0 }
 0x22c   :  { %v1071_v0 = vpack.c.bf16 %v1068_v61, %v1068_v61 }
 0x244   :  { %v979_v47 = vpop.f32.mrb[4].mxu0 }
 0x245   :  { %v1597_v48 = vadd.f32 %v979_v47, %v380_v45  ;;  %v981_v49 = vpop.f32.mrb[5].mxu0 }
 0x246   :  { %v1598_v50 = vadd.f32 %v981_v49, %v384_v46  ;;  %v983_v51 = vpop.f32.mrb[6].mxu0 }
 0x247   :  { %v1066_v52 = vmax.f32 %v1597_v48, 0.0  ;;  %v984_v39 = vpop.f32.mrb[7].mxu0 }
 0x248   :  { %v1067_v53 = vmax.f32 %v1598_v50, 0.0 }
 0x249   :  { %v1069_v56 = vpack.c.bf16 %v1066_v52, %v1066_v52 }
 0x24a   :  { %v1070_v54 = vpack.c.bf16 %v1067_v53, %v1067_v53 }
 0x24c   :  { %1303 = vmatprep.mubr.bf16.mxu1 %v1070_v54 }
 0x24d   :  { %1304 = vmatmul.mubr.bf16.vlgmr.msra.gmra.mrb[12].mxu1 %v1069_v56 }
 0x24e   :  { %1578 = vmatpush3.bf16.msra.mxu1 %v1773_v55  ;;  %1593 = vmatprep.mubr.msk.bf16.mxu1 %vm1913_vm1, %v1912_v29 }
 0x24f   :  { %1579 = vmatprep.subr.bf16.mxu1 %v1912_v29 }
 0x252   :  { %1580 = vmatpush3.bf16.msra.mxu1 %v1774_v57 }
 0x253   :  { %1581 = vmatprep.subr.bf16.mxu1 %v1912_v29 }
 0x256   :  { %1582 = vmatpush3.bf16.msra.mxu1 %v1775_v62 }
 0x257   :  { %1583 = vmatprep.subr.bf16.mxu1 %v1912_v29 }
 0x25a   :  { %1584 = vmatpush3.bf16.msra.mxu1 %v1776_v63 }
 0x25b   :  { %1585 = vmatprep.subr.bf16.mxu1 %v1912_v29 }
 0x25e   :  { %1586 = vmatpush3.bf16.msra.mxu1 %v1777_v1 }
 0x25f   :  { %1587 = vmatprep.subr.bf16.mxu1 %v1912_v29 }
 0x262   :  { %1588 = vmatpush3.bf16.msra.mxu1 %v1778_v58 }
 0x263   :  { %1589 = vmatprep.subr.bf16.mxu1 %v1912_v29 }
 0x266   :  { %1590 = vmatpush3.bf16.msra.mxu1 %v1779_v59 }
 0x267   :  { %1591 = vmatprep.subr.bf16.mxu1 %v1912_v29 }
 0x26a   :  { %1592 = vmatpush3.bf16.msra.mxu1 %v1780_v60 }
 0x26d   :  { %1594 = vmatmul.mubr.bf16.vlgmr.msra.gmra.mrb[16].mxu1 %v1071_v0 }
 0x320   :  { %v1562_v2 = vpop.f32.mrb[12].mxu1 }
 0x321   :  { %v1563_v3 = vpop.f32.mrb[13].mxu1 }
 0x322   :  { %v1564_v4 = vadd.f32 %v1563_v3, %v1562_v2  ;;  %v1565_v5 = vpop.f32.mrb[14].mxu1 }
 0x323   :  { %v1566_v6 = vpop.f32.mrb[15].mxu1 }
 0x324   :  { %v1306_v8 = vadd.f32 %v1564_v4, %v1477_v7 }
 0x340   :  { %v1345_v9 = vpop.f32.mrb[16].mxu1 }
 0x341   :  { %v1346_v10 = vadd.f32 %v1345_v9, %v1306_v8  ;;  %v1595_v11 = vpop.f32.mrb[17].mxu1 }
 0x342   :  { %v1348_v12 = vpop.f32.mrb[18].mxu1 }
 0x343   :  { %1781 = vtanh.f32 %v1346_v10  ;;  %v1596_v13 = vpop.f32.mrb[19].mxu1 }
 0x34d   :  { %v1782_v14 = vpop.eup %1781 }
 0x34e   :  { %v1352_v15 = vmul.f32 2.0, %v1782_v14 }
 0x350   :  { %1353 = vst [vmem:[#allocation10] sm:$0xff] %v1352_v15 }
 0x351   :  { %1882 = shalt.err (!%p1879_p8)
}
 0x352   :  { %s1883_s12 = scalar_lea.hbm %s2055_s7, 128 }
 0x353   :  { %p1884_p9 = scmp.ne.s32.totalorder %s2055_s7, %s1883_s12  ;;  %p1887_p10 = scmp.lt.u32.totalorder %s1883_s12, %s2055_s7 }
 0x355   :  { %p1889_p11 = pnand %p1887_p10, %p1884_p9 }
 0x357   :  { %1892 = shalt.err (!%p1889_p11)
}
 0x358   :  { %1363 = dma.vmem_to_hbm [thread:$0]  %s1361_s9, 128, %s2055_s7, [#allocation4]  }
 0x359   :  { %1899 = dma.done.wait [#allocation4], 128  }
 0x35a   :  { %1900 = vsyncadd [#allocation4], 4294967168 }
 0x35b   :  { %1367 = vsyncpa [#allocation3], 1 }
 0x35c   :  { %1368 = vsyncpa [#allocation6], 1 }
 0x35d   :  { %1369 = vsyncpa [#allocation9], 1 }
 0x35e   :  { %1370 = vsyncpa [#allocation4], 1 }

</bundles_post_ra>
